<compile_context>
chip_gen: v7x
topology: tpu7x:2x2x1
jax: 0.10.0
libtpu: 0.0.40
codegen_flags: <defaults>
</compile_context>

<pallas_src>
import jax
import jax.numpy as jnp
from jax.experimental import pallas as pl
from jax.experimental.pallas import tpu as pltpu

# ---- small config consistent with the module ----
VOCAB = 100          # input_dim (nn.Embedding rows actually used)
VOCAB_PAD = 128      # padded to one full lane width for MXU/vreg density
HIDDEN = 32          # hidden_dim == args.HIDDEN_DIM
BATCH = 2
SEQ = 8


# --------------------------- forward (single fused kernel) -------------------

def fasttext_forward(params, input_ids):
    """Mirrors FastText.forward: returns (x, (x, domain))."""
    B, S = input_ids.shape
    Vp, H = params["emb"].shape
    inv_s = 1.0 / float(S)

    def kernel(ids_ref, emb_ref, wd_ref, bd_ref, x_ref, dom_ref):
        # ids: (B*S, 1) int32, broadcast-compared against a lane-dense vocab iota
        ids = ids_ref[...]
        vocab_iota = jax.lax.broadcasted_iota(jnp.int32, (B * S, Vp), 1)
        onehot = (vocab_iota == ids).astype(jnp.float32)          # (B*S, Vp)

        # in-register pooling matrix: pool[b, t] = 1/S if token t belongs to batch b
        row = jax.lax.broadcasted_iota(jnp.int32, (B, B * S), 0)
        col = jax.lax.broadcasted_iota(jnp.int32, (B, B * S), 1)
        in_batch = (col >= row * S) & (col < (row + 1) * S)
        pool = jnp.where(in_batch, jnp.float32(inv_s), jnp.float32(0.0))  # (B, B*S)

        # fused embedding-gather + mean over seq:
        #   bow = pool @ onehot   -> normalized bag-of-words counts, lane-dense (B, 128)
        #   x   = bow @ emb       -> mean_seq(emb[ids]), exactly
        bow = jnp.dot(pool, onehot, preferred_element_type=jnp.float32)      # (B, Vp)
        x = jnp.dot(bow, emb_ref[...], preferred_element_type=jnp.float32)   # (B, H)
        x_ref[...] = x

        # EncoderBase.da: sigmoid(Linear(H, 1)(x))
        logit = jnp.dot(x, wd_ref[...], preferred_element_type=jnp.float32) + bd_ref[...]
        dom_ref[...] = jax.nn.sigmoid(logit)                                 # (B, 1)

    x, dom = pl.pallas_call(
        kernel,
        out_shape=(jax.ShapeDtypeStruct((B, H), jnp.float32),
                   jax.ShapeDtypeStruct((B, 1), jnp.float32)),
        in_specs=[pl.BlockSpec(memory_space=pltpu.MemorySpace.VMEM)] * 4,
        out_specs=(pl.BlockSpec(memory_space=pltpu.MemorySpace.VMEM),
                   pl.BlockSpec(memory_space=pltpu.MemorySpace.VMEM)),
    )(input_ids.reshape(B * S, 1).astype(jnp.int32),
      params["emb"],
      params["dom_w"],
      params["dom_b"].reshape(1, 1))

    domain = dom.reshape(-1)          # torch .squeeze() -> (B,)
    # args.train != 'train_dann' -> no GRL; da returns (x, domain)
    return x, (x, domain)


# --------------------------- parameters --------------------------------------

def init_params(key):
    k_emb, k_dom = jax.random.split(key)
    # nn.Embedding(input_dim, HIDDEN_DIM): rows >= VOCAB are zero padding (never indexed)
    emb = jax.random.normal(k_emb, (VOCAB, HIDDEN), jnp.float32)
    emb_padded = jnp.zeros((VOCAB_PAD, HIDDEN), jnp.float32).at[:VOCAB].set(emb)
    # nn.Linear(hidden_dim, 1) stored as (H, 1) weight + (1,) bias
    lim = 1.0 / (HIDDEN ** 0.5)
    dom_w = jax.random.uniform(k_dom, (HIDDEN, 1), jnp.float32, -lim, lim)
    dom_b = jnp.zeros((1,), jnp.float32)
    return dict(emb=emb_padded, dom_w=dom_w, dom_b=dom_b)


# --------------------------- main --------------------------------------------

if __name__ == "__main__":
    root = jax.random.PRNGKey(0)
    pkey, ikey = jax.random.split(root)

    params = init_params(pkey)
    input_ids = jax.random.randint(ikey, (BATCH, SEQ), 0, VOCAB)

    x, (feat, domain) = fasttext_forward(params, input_ids)
    jax.block_until_ready((x, feat, domain))

    assert x.shape == (BATCH, HIDDEN)
    assert feat.shape == (BATCH, HIDDEN)
    assert domain.shape == (BATCH,)

    # plain-JAX reference for the exact same math (embedding -> mean -> sigmoid head)
    ref_x = jnp.mean(params["emb"][:VOCAB][input_ids], axis=1)
    ref_dom = jax.nn.sigmoid(ref_x @ params["dom_w"] + params["dom_b"]).reshape(-1)
    assert jnp.allclose(x, ref_x, atol=1e-5, rtol=1e-5)
    assert jnp.allclose(domain, ref_dom, atol=1e-5, rtol=1e-5)
    assert bool(jnp.all(jnp.isfinite(x))) and bool(jnp.all(jnp.isfinite(domain)))

    print("KERNEL_OK")
</pallas_src>

<mosaic_0001>
module attributes {stable_mosaic.version = 11 : i64} {
  func.func @kernel(%arg0: memref<16x1xi32, #tpu.memory_space<vmem>>, %arg1: memref<128x32xf32, #tpu.memory_space<vmem>>, %arg2: memref<32x1xf32, #tpu.memory_space<vmem>>, %arg3: memref<1x1xf32, #tpu.memory_space<vmem>>, %arg4: memref<2x32xf32, #tpu.memory_space<vmem>>, %arg5: memref<2x1xf32, #tpu.memory_space<vmem>>) attributes {dimension_semantics = [], scalar_prefetch = 0 : i64, scratch_operands = 0 : i64, tpu.core_type = #tpu.core_type<tc>} {
    %c0 = arith.constant 0 : index
    %c0_0 = arith.constant 0 : index
    %0 = vector.load %arg0[%c0, %c0_0] : memref<16x1xi32, #tpu.memory_space<vmem>>, vector<16x1xi32>
    %1 = tpu.iota {dimensions = array<i32: 1>} : vector<16x128xi32>
    %2 = vector.broadcast %0 : vector<16x1xi32> to vector<16x128xi32>
    %3 = arith.cmpi eq, %1, %2 : vector<16x128xi32>
    %4 = arith.extui %3 : vector<16x128xi1> to vector<16x128xi32>
    %5 = arith.sitofp %4 : vector<16x128xi32> to vector<16x128xf32>
    %6 = tpu.iota {dimensions = array<i32: 0>} : vector<2x16xi32>
    %7 = tpu.iota {dimensions = array<i32: 1>} : vector<2x16xi32>
    %c8_i32 = arith.constant 8 : i32
    %8 = vector.broadcast %c8_i32 : i32 to vector<2x16xi32>
    %9 = arith.muli %6, %8 : vector<2x16xi32>
    %10 = arith.cmpi sge, %7, %9 : vector<2x16xi32>
    %c1_i32 = arith.constant 1 : i32
    %11 = vector.broadcast %c1_i32 : i32 to vector<2x16xi32>
    %12 = arith.addi %6, %11 : vector<2x16xi32>
    %c8_i32_1 = arith.constant 8 : i32
    %13 = vector.broadcast %c8_i32_1 : i32 to vector<2x16xi32>
    %14 = arith.muli %12, %13 : vector<2x16xi32>
    %15 = arith.cmpi slt, %7, %14 : vector<2x16xi32>
    %16 = arith.andi %10, %15 : vector<2x16xi1>
    %cst = arith.constant 1.250000e-01 : f32
    %cst_2 = arith.constant 0.000000e+00 : f32
    %17 = vector.broadcast %cst : f32 to vector<2x16xf32>
    %18 = vector.broadcast %cst_2 : f32 to vector<2x16xf32>
    %19 = arith.select %16, %17, %18 : vector<2x16xi1>, vector<2x16xf32>
    %cst_3 = arith.constant dense<0.000000e+00> : vector<2x128xf32>
    %20 = tpu.matmul %19, %5, %cst_3 {dimension_numbers = #tpu.dot_dimension_numbers<[1], [0], [0], [1], [0, 0, 1, 1], [], []>} : vector<2x16xf32>, vector<16x128xf32>, vector<2x128xf32> -> vector<2x128xf32>
    %c0_4 = arith.constant 0 : index
    %c0_5 = arith.constant 0 : index
    %21 = vector.load %arg1[%c0_4, %c0_5] : memref<128x32xf32, #tpu.memory_space<vmem>>, vector<128x32xf32>
    %cst_6 = arith.constant dense<0.000000e+00> : vector<2x32xf32>
    %22 = tpu.matmul %20, %21, %cst_6 {dimension_numbers = #tpu.dot_dimension_numbers<[1], [0], [0], [1], [0, 0, 1, 1], [], []>} : vector<2x128xf32>, vector<128x32xf32>, vector<2x32xf32> -> vector<2x32xf32>
    %c0_7 = arith.constant 0 : index
    %c0_8 = arith.constant 0 : index
    %23 = vector.load %arg4[%c0_7, %c0_8] : memref<2x32xf32, #tpu.memory_space<vmem>>, vector<2x32xf32>
    tpu.vector_store %arg4[%c0_7, %c0_8], %22 {strides = array<i32>} : memref<2x32xf32, #tpu.memory_space<vmem>>, vector<2x32xf32>,
    %c0_9 = arith.constant 0 : index
    %c0_10 = arith.constant 0 : index
    %24 = vector.load %arg2[%c0_9, %c0_10] : memref<32x1xf32, #tpu.memory_space<vmem>>, vector<32x1xf32>
    %cst_11 = arith.constant dense<0.000000e+00> : vector<2x1xf32>
    %25 = tpu.matmul %22, %24, %cst_11 {dimension_numbers = #tpu.dot_dimension_numbers<[1], [0], [0], [1], [0, 0, 1, 1], [], []>} : vector<2x32xf32>, vector<32x1xf32>, vector<2x1xf32> -> vector<2x1xf32>
    %c0_12 = arith.constant 0 : index
    %c0_13 = arith.constant 0 : index
    %26 = vector.load %arg3[%c0_12, %c0_13] : memref<1x1xf32, #tpu.memory_space<vmem>>, vector<1x1xf32>
    %27 = vector.broadcast %26 : vector<1x1xf32> to vector<2x1xf32>
    %28 = arith.addf %25, %27 : vector<2x1xf32>
    %29 = arith.negf %28 : vector<2x1xf32>
    %30 = math.exp %29 : vector<2x1xf32>
    %cst_14 = arith.constant 1.000000e+00 : f32
    %31 = vector.broadcast %cst_14 : f32 to vector<2x1xf32>
    %32 = arith.addf %31, %30 : vector<2x1xf32>
    %33 = arith.divf %31, %32 : vector<2x1xf32>
    %c0_15 = arith.constant 0 : index
    %c0_16 = arith.constant 0 : index
    %34 = vector.load %arg5[%c0_15, %c0_16] : memref<2x1xf32, #tpu.memory_space<vmem>>, vector<2x1xf32>
    tpu.vector_store %arg5[%c0_15, %c0_16], %33 {strides = array<i32>} : memref<2x1xf32, #tpu.memory_space<vmem>>, vector<2x1xf32>,
    return
  }
}

</mosaic_0001>

<bundles_post_ra>
// kernel: tpu_custom_call.1
= control target key start
LH: loop header
LB: loop body
LE: loop exit
PB: predicated region body
PF: predicated region fallthrough
CT: control target
= control target key end

     0   :  { %s608_s0 = inlined_call_operand.vmem [shape: s32[16,1], index: 0, kind: input, shape index: {}]   ;;  %s609_s1 = inlined_call_operand.vmem [shape: f32[128,32], index: 1, kind: input, shape index: {}]   ;;  %s610_s2 = inlined_call_operand.vmem [shape: f32[32,1], index: 2, kind: input, shape index: {}]   ;;  %s611_s3 = inlined_call_operand.<no memory space> [shape: f32[1,1], index: 3, kind: input, shape index: {}]   ;;  %s612_s4 = inlined_call_operand.hbm [shape: f32[2,32], index: 4, kind: output, shape index: {0}]   ;;  %s613_s5 = inlined_call_operand.vmem [shape: f32[2,1], index: 5, kind: output, shape index: {1}]  }
   0x1   :  { %v11_v0 = vstv %s611_s3 }
   0x2   :  { %12 = vst [vmem:[#allocation2] sm:$0x1] %v11_v0 }
   0x3   :  { %v22_v1 = vld [vmem:[%s608_s0] sm:$0xff] }
   0x4   :  { %13 = vsyncpa [#allocation4], 0  ;;  %v474_v2 = vmov 0   ;;  %v23_v3 = vld [vmem:[%s608_s0 + $0x8] sm:$0xff]  ;;  %v475_v4 = vmov 0.0|0.0   ;;  %vm476_vm0 = vmmov 0   ;;  %v24_v30 = vlaneseq }
   0x5   :  { %445 = vset.pattern.permute.xlu0 %v474_v2  ;;  %406 = vmatprep.subr.bf16.mxu0 %v475_v4  ;;  %v477_v5 = vmov 0.0   ;;  %v121_v6 = vld [vmem:[%s609_s1] sm:$0xff]  ;;  %v122_v7 = vld [vmem:[%s609_s1 + $0x8] sm:$0xff]  ;;  %v123_v8 = vld [vmem:[%s609_s1 + $0x10] sm:$0xff]  ;;  %v478_v38 = vmov 1.0|1.0  }
   0x6   :  { %27 = vperm.xlu0 %445, %v22_v1   ;;  %409 = vmatprep.subr.bf16.mxu1 %v475_v4  ;;  %v410_v9 = vpack.c.bf16 %v122_v7, %v121_v6  ;;  %v124_v10 = vld [vmem:[%s609_s1 + $0x18] sm:$0xff]  ;;  %v125_v12 = vld [vmem:[%s609_s1 + $0x20] sm:$0xff]  ;;  %v126_v13 = vld [vmem:[%s609_s1 + $0x28] sm:$0xff]  ;;  %v39_v31 = vshrl.u32 %v24_v30, 7  ;;  %v25_v35 = vand.u32 127, %v24_v30  ;;  %vm47_vm7 = vcmask 130048  }
   0x7   :  { %357 = vmatprep.mubr.msk.f32.mxu0 %vm476_vm0, %v477_v5  ;;  %392 = vmatprep.mubr.msk.f32.mxu1 %vm476_vm0, %v477_v5  ;;  %v413_v11 = vpack.c.bf16 %v124_v10, %v123_v8  ;;  %v416_v14 = vpack.c.bf16 %v126_v13, %v125_v12  ;;  %v127_v15 = vld [vmem:[%s609_s1 + $0x30] sm:$0xff]  ;;  %v128_v16 = vld [vmem:[%s609_s1 + $0x38] sm:$0xff]  ;;  %v129_v18 = vld [vmem:[%s609_s1 + $0x40] sm:$0xff]  ;;  %vm220_vm8 = vcmask 261120   ;;  %vm207_vm9 = vcmask 254976   ;;  %s479_s9 = smov [#allocation3]  }
   0x8   :  { %411 = vmatpush3.bf16.msra.mxu1 %v410_v9  ;;  %v419_v17 = vpack.c.bf16 %v128_v16, %v127_v15  ;;  %v130_v19 = vld [vmem:[%s609_s1 + $0x48] sm:$0xff]  ;;  %v131_v21 = vld [vmem:[%s609_s1 + $0x50] sm:$0xff]  ;;  %v132_v22 = vld [vmem:[%s609_s1 + $0x58] sm:$0xff]  ;;  %v42_v32 = vadd.s32 1, %v39_v31  ;;  %v40_v33 = vmul.u32 8, %v39_v31  ;;  %s308_s10 = sshll.u32 %s479_s9, 4  ;;  %s309_s10 = int_to_ptr.vmem [resolvable:$true] %s308_s10 }
   0x9   :  { %412 = vmatprep.subr.bf16.mxu1 %v475_v4  ;;  %v422_v20 = vpack.c.bf16 %v130_v19, %v129_v18  ;;  %v425_v23 = vpack.c.bf16 %v132_v22, %v131_v21  ;;  %v133_v24 = vld [vmem:[%s609_s1 + $0x60] sm:$0xff]  ;;  %v134_v25 = vld [vmem:[%s609_s1 + $0x68] sm:$0xff]  ;;  %v135_v27 = vld [vmem:[%s609_s1 + $0x70] sm:$0xff]  ;;  %s450_s11 = scalar_lea.vmem %s309_s10, 32  ;;  %p455_p1 = scmp.lt.s32.totalorder %s309_s10, %s309_s10 }
   0xa   :  { %30 = vperm.xlu0 %445, %v23_v3   ;;  %v428_v26 = vpack.c.bf16 %v134_v25, %v133_v24  ;;  %v136_v28 = vld [vmem:[%s609_s1 + $0x78] sm:$0xff]  ;;  %v43_v34 = vmul.u32 8, %v42_v32  ;;  %vm41_vm1 = vcmp.ge.s32.totalorder %v25_v35, %v40_v33  ;;  %v209_v40 = vld [vmem:[%s610_s2] sm:$0xff]  ;;  %v210_v41 = vld [vmem:[%s610_s2 + $0x8] sm:$0xff]  ;;  %p451_p0 = scmp.ne.s32.totalorder %s309_s10, %s450_s11  ;;  %p456_p2 = scmp.lt.s32.totalorder %s450_s11, %s450_s11 }
   0xb   :  { %v431_v29 = vpack.c.bf16 %v136_v28, %v135_v27  ;;  %v211_v42 = vld [vmem:[%s610_s2 + $0x10] sm:$0xff]  ;;  %v434_v43 = vpack.c.bf16 %v210_v41, %v209_v40  ;;  %v212_v44 = vld [vmem:[%s610_s2 + $0x18] sm:$0xff] }
   0xc   :  { %414 = vmatpush3.bf16.msra.mxu1 %v413_v11  ;;  %vm44_vm2 = vcmp.lt.s32.totalorder %v25_v35, %v43_v34  ;;  %v437_v45 = vpack.c.bf16 %v212_v44, %v211_v42  ;;  %p457_p3 = por %p456_p2, %p455_p1 }
   0xd   :  { %415 = vmatprep.subr.bf16.mxu1 %v475_v4  ;;  %vm45_vm3 = vmand %vm41_vm1, %vm44_vm2 }
   0xe   :  { %v46_v39 = vsel %vm45_vm3, 0.125, %v477_v5  ;;  %p458_p4 = pnand %p457_p3, %p451_p0 }
  0x10   :  { %417 = vmatpush3.bf16.msra.mxu1 %v416_v14 }
  0x11   :  { %418 = vmatprep.subr.bf16.mxu1 %v475_v4 }
  0x14   :  { %420 = vmatpush3.bf16.msra.mxu1 %v419_v17 }
  0x15   :  { %421 = vmatprep.subr.bf16.mxu1 %v475_v4 }
  0x18   :  { %423 = vmatpush3.bf16.msra.mxu1 %v422_v20 }
  0x19   :  { %424 = vmatprep.subr.bf16.mxu1 %v475_v4 }
  0x1c   :  { %426 = vmatpush3.bf16.msra.mxu1 %v425_v23 }
  0x1d   :  { %427 = vmatprep.subr.bf16.mxu1 %v475_v4 }
  0x20   :  { %429 = vmatpush3.bf16.msra.mxu1 %v428_v26 }
  0x21   :  { %430 = vmatprep.subr.bf16.mxu1 %v475_v4 }
  0x24   :  { %432 = vmatpush3.bf16.msra.mxu1 %v431_v29 }
  0x85   :  { %v28_v36 = vpop.permute.xlu0 %27 }
  0x86   :  { %vm32_vm4 = vcmp.eq.s32.totalorder %v25_v35, %v28_v36 }
  0x89   :  { %v31_v37 = vpop.permute.xlu0 %30 }
  0x8a   :  { %vm33_vm5 = vcmp.eq.s32.totalorder %v25_v35, %v31_v37 }
  0x8b   :  { %vm407_vm6 = vmpackc.low %vm33_vm5, %vm32_vm4 }
  0x8c   :  { %408 = vmatpush3.bf16.msk.msra.mxu0 %vm407_vm6, %v478_v38 }
  0x8d   :  { %433 = vmatprep.subr.bf16.mxu0 %v475_v4 }
  0x8f   :  { %358 = vmatmul.mubr.msk.f32.vlgmr.msra.gmra.mrb[0].mxu0 %vm47_vm7, %v46_v39 }
  0x90   :  { %403 = vmatprep.mubr.msk.f32.mxu0 %vm476_vm0, %v477_v5  ;;  %435 = vmatpush3.bf16.msra.mxu0 %v434_v43 }
  0x91   :  { %436 = vmatprep.subr.bf16.mxu0 %v475_v4 }
  0x94   :  { %438 = vmatpush3.bf16.msra.mxu0 %v437_v45 }
 0x162   :  { %v117_v46 = vpop.f32.mrb[0].mxu0 }
 0x163   :  { %v359_v47 = vpop.f32.mrb[1].mxu0  ;;  %393 = vmatmul.mubr.f32.vlgmr.msra.gmra.mrb[0].mxu1 %v117_v46 }
 0x236   :  { %v203_v48 = vpop.f32.mrb[0].mxu1 }
 0x237   :  { %v394_v49 = vpop.f32.mrb[1].mxu1  ;;  %404 = vmatmul.mubr.msk.f32.vlgmr.msra.gmra.mrb[2].mxu0 %vm220_vm8, %v203_v48  ;;  %208 = vst.msk [vmem:[#allocation3] sm:$0x3] %vm207_vm9, %v203_v48 }
 0x238   :  { %461 = shalt.err (!%p458_p4)
}
 0x239   :  { %s462_s13 = scalar_lea.hbm %s612_s4, 32 }
 0x23a   :  { %p463_p5 = scmp.ne.s32.totalorder %s612_s4, %s462_s13  ;;  %p466_p6 = scmp.lt.u32.totalorder %s462_s13, %s612_s4 }
 0x23c   :  { %p468_p7 = pnand %p466_p6, %p463_p5 }
 0x23e   :  { %471 = shalt.err (!%p468_p7)
}
 0x23f   :  { %311 = dma.vmem_to_hbm [thread:$0]  %s309_s10, 32, %s612_s4, [#allocation4]   ;;  %v325_v50 = vld [vmem:[#allocation2] ss:$0 sm:$0xff]  ;;  %vm300_vm10 = vcmask 1024  }
 0x30a   :  { %v290_v51 = vpop.f32.mrb[2].mxu0 }
 0x30b   :  { %v291_v52 = vadd.f32 %v325_v50, %v290_v51  ;;  %v405_v53 = vpop.f32.mrb[3].mxu0 }
 0x30d   :  { %v327_v54 = vmul.f32 -1.442695, %v291_v52 }
 0x30f   :  { %446 = vpow2.f32 %v327_v54 }
 0x319   :  { %v447_v55 = vpop.eup %446 }
 0x31a   :  { %v297_v56 = vadd.f32 1.0, %v447_v55 }
 0x31c   :  { %448 = vrcp.f32 %v297_v56 }
 0x326   :  { %v449_v57 = vpop.eup %448 }
 0x327   :  { %301 = vst.msk [vmem:[%s613_s5] sm:$0x3] %vm300_vm10, %v449_v57 }
 0x328   :  { %472 = dma.done.wait [#allocation4], 32  }
 0x329   :  { %473 = vsyncadd [#allocation4], 4294967264 }
 0x32a   :  { %319 = vsyncpa [#allocation4], 1 }

</bundles_post_ra>
